<compile_context>
chip_gen: v7x
topology: tpu7x:2x2x1
jax: 0.10.0
libtpu: 0.0.40
codegen_flags: <defaults>
</compile_context>

<pallas_src>
import jax
import jax.numpy as jnp
from jax.experimental import pallas as pl
from jax.experimental.pallas import tpu as pltpu


def _copy_kernel(x_ref, o_ref):
    # Plain whole-tile copy; the prefix slice is encoded in the BlockSpecs.
    o_ref[...] = x_ref[...]


def _round_up(x: int, m: int) -> int:
    return ((x + m - 1) // m) * m


def _sublane_multiple(dtype) -> int:
    # f32 -> 8, bf16/f16 -> 16, int8/fp8 -> 32 (packed rows travel in groups).
    bits = jnp.dtype(dtype).itemsize * 8
    return max(8, 256 // bits)


def _vmem_capacity_bytes() -> int:
    # Generation-aware VMEM budget; conservative fallback = v7x per-TC 64 MiB.
    try:
        return int(pltpu.get_tpu_info().vmem_capacity_bytes)
    except Exception:
        return 64 * 1024 * 1024


def chomp1d(x: jnp.ndarray, chomp_size: int, *, force_kernel: bool = False) -> jnp.ndarray:
    """Pallas implementation of Chomp1d.forward: x[:, :, :-chomp_size]."""
    assert chomp_size > 0, "chomp_size must be positive"
    n, c, l = x.shape
    l_out = l - chomp_size
    assert l_out > 0, "chomp_size must be smaller than the sequence length"

    if l_out < 128 and not force_kernel:
        # Tiny, lane-sparse copy: pallas_call launch/pipeline overhead dominates;
        # XLA's native slice is strictly faster here.
        return x[:, :, :l_out]

    rows = n * c
    x2 = x.reshape(rows, l)

    itemsize = jnp.dtype(x.dtype).itemsize
    sub = _sublane_multiple(x.dtype)

    vmem_cap = _vmem_capacity_bytes()
    # Per-buffer tile budget: 8 MiB where VMEM allows, scaled down otherwise.
    # Footprint ~= 4x per-buffer (in + out, double-buffered) -> <= 32 MiB,
    # which fits v7x's 64 MiB per-TC VMEM with headroom and v5e/v6e easily.
    per_buffer_target = min(8 * 1024 * 1024, vmem_cap // 8)

    # Lane tile: full rounded-up L_out when it fits the budget at >= one
    # sublane-group of rows (this is the common case -> ~1-D grid over rows).
    max_tl = max(128, (per_buffer_target // (sub * itemsize)) // 128 * 128)
    tl = min(_round_up(l_out, 128), max_tl)

    # Row tile: multiple of the sublane packing, sized to the byte budget.
    max_tr = max(sub, (per_buffer_target // (tl * itemsize)) // sub * sub)
    tr = min(max_tr, _round_up(rows, sub))
    # v7x megacore: guarantee >= 2 blocks on the parallel row axis when possible.
    if tr >= rows and rows >= 2 * sub:
        tr = _round_up(pl.cdiv(rows, 2), sub)

    grid = (pl.cdiv(rows, tr), pl.cdiv(l_out, tl))

    per_buffer_bytes = tr * tl * itemsize
    # in + out, double-buffered, plus slack for Mosaic internal scratch; never
    # more than 3/4 of physical VMEM (leaves >= 16 MiB headroom on v7x).
    vmem_limit = int(min(vmem_cap * 3 // 4, 4 * per_buffer_bytes + (8 << 20)))

    out2 = pl.pallas_call(
        _copy_kernel,
        out_shape=jax.ShapeDtypeStruct((rows, l_out), x.dtype),
        grid_spec=pltpu.PrefetchScalarGridSpec(
            num_scalar_prefetch=0,
            grid=grid,
            in_specs=[
                # Same block index map as the output: only the leading L_out
                # columns of x are fetched (up to one ragged tail tile).
                pl.BlockSpec((tr, tl), lambda r, k: (r, k)),
            ],
            out_specs=pl.BlockSpec((tr, tl), lambda r, k: (r, k)),
        ),
        compiler_params=pltpu.CompilerParams(
            # Pure copy: nothing carries across either axis -> both parallel,
            # so v7x can shard the row (and if present, column) blocks.
            dimension_semantics=("parallel", "parallel"),
            vmem_limit_bytes=vmem_limit,
        ),
        cost_estimate=pl.CostEstimate(
            flops=0,
            transcendentals=0,
            bytes_accessed=2 * rows * l_out * itemsize,
        ),
    )(x2)

    return out2.reshape(n, c, l_out)


if __name__ == "__main__":
    key = jax.random.PRNGKey(0)

    # Primary case: small shapes consistent with Conv1d inputs (N, C, L).
    # force_kernel=True so the Pallas path (not the tiny-input fallback) runs.
    batch, channels, seq_len = 2, 4, 16
    chomp_size = 3
    x = jax.random.normal(key, (batch, channels, seq_len), dtype=jnp.float32)

    y = chomp1d(x, chomp_size, force_kernel=True)
    y = jax.block_until_ready(y)

    y_ref = x[:, :, :-chomp_size]
    assert y.shape == (batch, channels, seq_len - chomp_size), y.shape
    assert jnp.array_equal(y, y_ref), "Pallas Chomp1d mismatch vs reference (f32)"

    # Secondary check: bf16, non-multiple-of-128 length, ragged rows; this
    # shape takes the kernel path naturally (l_out >= 128).
    x2 = jax.random.normal(jax.random.PRNGKey(1), (3, 5, 260), dtype=jnp.bfloat16)
    y2 = jax.block_until_ready(chomp1d(x2, 7))
    y2_ref = x2[:, :, :-7]
    assert y2.shape == (3, 5, 253), y2.shape
    assert jnp.array_equal(y2, y2_ref), "Pallas Chomp1d mismatch vs reference (bf16)"

    # Tiny-input fallback path (plain slice) stays correct too.
    y3 = jax.block_until_ready(chomp1d(x, chomp_size))
    assert jnp.array_equal(y3, y_ref), "Fallback Chomp1d mismatch vs reference"

    print("KERNEL_OK")
</pallas_src>

<mosaic_0001>
module attributes {stable_mosaic.version = 11 : i64} {
  func.func @_copy_kernel(%arg0: i32, %arg1: i32, %arg2: memref<8x128xf32, #tpu.memory_space<vmem>>, %arg3: memref<8x128xf32, #tpu.memory_space<vmem>>) attributes {dimension_semantics = [#tpu.dimension_semantics<parallel>, #tpu.dimension_semantics<parallel>], iteration_bounds = array<i64: 1, 1>, scalar_prefetch = 0 : i64, scratch_operands = 0 : i64, tpu.core_type = #tpu.core_type<tc>, window_params = [{transform_indices = @transform_0, window_bounds = array<i64: 8, 128>}, {transform_indices = @transform_1, window_bounds = array<i64: 8, 128>}]} {
    %c0 = arith.constant 0 : index
    %c0_0 = arith.constant 0 : index
    %0 = vector.load %arg2[%c0, %c0_0] : memref<8x128xf32, #tpu.memory_space<vmem>>, vector<8x128xf32>
    %c0_1 = arith.constant 0 : index
    %c0_2 = arith.constant 0 : index
    %1 = vector.load %arg3[%c0_1, %c0_2] : memref<8x128xf32, #tpu.memory_space<vmem>>, vector<8x128xf32>
    tpu.vector_store %arg3[%c0_1, %c0_2], %0 {strides = array<i32>} : memref<8x128xf32, #tpu.memory_space<vmem>>, vector<8x128xf32>,
    return
  }
  func.func @transform_0(%arg0: i32, %arg1: i32) -> (i32, i32) {
    %c0_i32 = arith.constant 0 : i32
    return %arg0, %arg1 : i32, i32
  }
  func.func @transform_1(%arg0: i32, %arg1: i32) -> (i32, i32) {
    %c0_i32 = arith.constant 0 : i32
    return %arg0, %arg1 : i32, i32
  }
}

</mosaic_0001>

<bundles_post_ra>
// kernel: tpu_custom_call.1
= control target key start
LH: loop header
LB: loop body
LE: loop exit
PB: predicated region body
PF: predicated region fallthrough
CT: control target
= control target key end

     0   :  { %6 = vsyncpa [#allocation3], 0  ;;  %s124_s0 = inlined_call_operand.hbm [shape: f32[8,16], index: 0, kind: input, shape index: {}]   ;;  %s125_s1 = inlined_call_operand.hbm [shape: f32[8,13], index: 1, kind: output, shape index: {}]  }
   0x1   :  { %7 = vsyncpa [#allocation4], 0  ;;  %s88_s6 = smov [#allocation2]   ;;  %s40_s10 = scalar_lea.hbm %s124_s0, 128 }
   0x2   :  { %s14_s7 = sshll.u32 %s88_s6, 4  ;;  %p41_p0 = scmp.ne.s32.totalorder %s124_s0, %s40_s10  ;;  %s15_s7 = int_to_ptr.vmem [resolvable:$true] %s14_s7 }
   0x3   :  { %p44_p1 = scmp.lt.u32.totalorder %s40_s10, %s124_s0 }
   0x5   :  { %p46_p2 = pnand %p44_p1, %p41_p0 }
   0x7   :  { %49 = shalt.err (!%p46_p2)
}
   0x8   :  { %s50_s15 = scalar_lea.vmem %s15_s7, 128  ;;  %p55_p4 = scmp.lt.s32.totalorder %s15_s7, %s15_s7 }
   0x9   :  { %p51_p3 = scmp.ne.s32.totalorder %s15_s7, %s50_s15  ;;  %p56_p5 = scmp.lt.s32.totalorder %s50_s15, %s50_s15 }
   0xb   :  { %p57_p6 = por %p56_p5, %p55_p4 }
   0xd   :  { %p58_p7 = pnand %p57_p6, %p51_p3 }
   0xf   :  { %61 = shalt.err (!%p58_p7)
}
  0x10   :  { %17 = dma.hbm_to_vmem [thread:$0]  %s124_s0, 128, %s15_s7, [#allocation3]  }
  0x11   :  { %84 = dma.done.wait [#allocation3], 128  }
  0x12   :  { %85 = vsyncadd [#allocation3], 4294967168  ;;  %s89_s18 = smov [#allocation5]   ;;  %v21_v0 = vld [vmem:[#allocation2] sm:$0xff] }
  0x13   :  { %s29_s19 = sshll.u32 %s89_s18, 4  ;;  %22 = vst [vmem:[#allocation5] sm:$0xff] %v21_v0  ;;  %s30_s19 = int_to_ptr.vmem [resolvable:$true] %s29_s19 }
  0x14   :  { %s62_s20 = scalar_lea.vmem %s30_s19, 128  ;;  %p67_p9 = scmp.lt.s32.totalorder %s30_s19, %s30_s19 }
  0x15   :  { %p63_p8 = scmp.ne.s32.totalorder %s30_s19, %s62_s20  ;;  %p68_p10 = scmp.lt.s32.totalorder %s62_s20, %s62_s20 }
  0x17   :  { %p69_p11 = por %p68_p10, %p67_p9 }
  0x19   :  { %p70_p12 = pnand %p69_p11, %p63_p8 }
  0x1b   :  { %73 = shalt.err (!%p70_p12)
}
  0x1c   :  { %s74_s23 = scalar_lea.hbm %s125_s1, 128 }
  0x1d   :  { %p75_p13 = scmp.ne.s32.totalorder %s125_s1, %s74_s23  ;;  %p78_p0 = scmp.lt.u32.totalorder %s74_s23, %s125_s1 }
  0x1f   :  { %p80_p1 = pnand %p78_p0, %p75_p13 }
  0x21   :  { %83 = shalt.err (!%p80_p1)
}
  0x22   :  { %32 = dma.vmem_to_hbm [thread:$0]  %s30_s19, 128, %s125_s1, [#allocation4]  }
  0x23   :  { %86 = dma.done.wait [#allocation4], 128  }
  0x24   :  { %87 = vsyncadd [#allocation4], 4294967168 }
  0x25   :  { %36 = vsyncpa [#allocation3], 1 }
  0x26   :  { %37 = vsyncpa [#allocation4], 1 }

</bundles_post_ra>
